<compile_context>
chip_gen: v7x
topology: tpu7x:2x2x1
jax: 0.10.0
libtpu: 0.0.40
codegen_flags: <defaults>
</compile_context>

<pallas_src>
import functools

import jax
import jax.numpy as jnp
import numpy as np
from jax.experimental import pallas as pl
from jax.experimental.pallas import tpu as pltpu

NUM_LAYERS = 3
EMB_DIM = 9                    # GNN_node_Virtualnode(emb_dim=9)
HID_DIM = 2 * EMB_DIM          # 18
BN_EPS = 1e-5

# ---- packed parameter slab layout (all row starts are multiples of 8) ----
_SLAB_W = HID_DIM              # 18 columns
_W1_OFF = 0                    # w1^T  [H, D]  -> rows  0..17 (block of 24)
_B1_OFF = 24                   # b1    [H, 1]  -> rows 24..41 (block of 24)
_W2_OFF = 48                   # w2^T  [D, H]  -> rows 48..56 (block of 16)
_B2_OFF = 64                   # b2    [D, 1]  -> rows 64..72 (block of 16)
_BLK = 80                      # rows per MLP block
_VN_BASE = NUM_LAYERS * _BLK                     # virtual-node MLP blocks
_VN0_OFF = _VN_BASE + (NUM_LAYERS - 1) * _BLK    # initial VN embedding col
_SLAB_ROWS = _VN0_OFF + 16


def _unpack_mlp(P, base):
    """Static, sublane-aligned slices of the packed parameter slab."""
    w1t = P[base + _W1_OFF:base + _W1_OFF + HID_DIM, :EMB_DIM]   # [H, D]
    b1 = P[base + _B1_OFF:base + _B1_OFF + HID_DIM, 0:1]         # [H, 1]
    w2t = P[base + _W2_OFF:base + _W2_OFF + EMB_DIM, :HID_DIM]   # [D, H]
    b2 = P[base + _B2_OFF:base + _B2_OFF + EMB_DIM, 0:1]         # [D, 1]
    return w1t, b1, w2t, b2


def subgraph_gnn_kernel(
    eps_ref,        # SMEM [L]        GINConv eps
    h0_ref,         # [D, N] f32      atom-encoded node features (lane-dense)
    src_ref,        # [1, E] int32    edge source node ids
    dst_ref,        # [E, 1] int32    edge destination node ids
    brow_ref,       # [1, N] int32    graph id per node
    bcol_ref,       # [N, 1] int32    graph id per node (column form)
    edge_emb_ref,   # [L, D, E] f32   per-layer bond embeddings
    params_ref,     # [R, 18] f32     packed BN-folded weights + vn0
    out_ref,        # [D, 1] f32
    *, num_graphs,
):
    f32 = jnp.float32
    h = h0_ref[...]                           # [D, N]
    P = params_ref[...]
    D, N = h.shape
    E = src_ref.shape[1]
    G = num_graphs

    # Exact 0/1 structure masks built on the VPU from int32 indices.
    # (no O(E*N) HBM traffic, no persistent f32 copies of inputs)
    gath = (jax.lax.broadcasted_iota(jnp.int32, (N, E), 0)
            == src_ref[...]).astype(f32)      # [N, E]: gath[n,e] = (src[e]==n)
    scat = (jax.lax.broadcasted_iota(jnp.int32, (E, N), 1)
            == dst_ref[...]).astype(f32)      # [E, N]: scat[e,n] = (dst[e]==n)
    pool = (jax.lax.broadcasted_iota(jnp.int32, (G, N), 0)
            == brow_ref[...]).astype(f32)     # [G, N]
    pool_t = (jax.lax.broadcasted_iota(jnp.int32, (N, G), 1)
              == bcol_ref[...]).astype(f32)   # [N, G]  (no in-kernel transpose)

    # Initial virtual-node embedding (trained nn.Embedding(1, D) weight).
    vn0 = P[_VN0_OFF:_VN0_OFF + EMB_DIM, 0:1]          # [D, 1]
    vn = jnp.broadcast_to(vn0, (EMB_DIM, G))           # [D, G]

    for layer in range(NUM_LAYERS):
        # broadcast each graph's virtual node to its nodes
        h_in = h + jnp.dot(vn, pool, preferred_element_type=f32)      # [D, N]

        # ---------------- GINConv ----------------
        x_src = jnp.dot(h_in, gath, preferred_element_type=f32)       # x_j [D,E]
        msg = jnp.maximum(x_src + edge_emb_ref[layer], 0.0)           # relu(x_j+e)
        aggr = jnp.dot(msg, scat, preferred_element_type=f32)         # [D, N]
        z = (1.0 + eps_ref[layer]) * h_in + aggr

        w1t, b1, w2t, b2 = _unpack_mlp(P, layer * _BLK)
        z = jnp.maximum(jnp.dot(w1t, z, preferred_element_type=f32) + b1, 0.0)
        h = jnp.dot(w2t, z, preferred_element_type=f32) + b2          # outer BN folded
        if layer < NUM_LAYERS - 1:                                    # no relu on last
            h = jnp.maximum(h, 0.0)
        h = h + h_in                                                  # residual=True

        # ---------------- virtual-node update ----------------
        if layer < NUM_LAYERS - 1:
            vn_tmp = jnp.dot(h_in, pool_t, preferred_element_type=f32) + vn   # [D,G]
            vw1t, vb1, vw2t, vb2 = _unpack_mlp(P, _VN_BASE + layer * _BLK)
            t = jnp.maximum(jnp.dot(vw1t, vn_tmp, preferred_element_type=f32) + vb1, 0.0)
            t = jnp.maximum(jnp.dot(vw2t, t, preferred_element_type=f32) + vb2, 0.0)
            vn = vn + t

    # global_add_pool (masked per-graph sums) then torch.sum(dim=0, keepdim=True)
    pooled = jnp.dot(h, pool_t, preferred_element_type=f32)           # [D, G]
    out_ref[...] = jnp.sum(pooled, axis=1, keepdims=True)             # [D, 1]


def _fold_bn(w, bias, bn):
    """Fold eval-mode BatchNorm1d into the preceding Linear, per layer."""
    g, b, m, v = bn[:, 0], bn[:, 1], bn[:, 2], bn[:, 3]      # each [L, dim_out]
    s = g * jax.lax.rsqrt(v + BN_EPS)
    return w * s[:, None, :], bias * s[:, None, :] + (b - m * s)[:, None, :]


def _pack_params(w1f, b1f, w2f, b2f, vw1f, vb1f, vw2f, vb2f, vn0):
    """Pack all BN-folded, transposed Linear params + vn0 into one aligned slab."""
    def blk(x_t, rows):
        r, c = x_t.shape
        return jnp.pad(x_t, ((0, rows - r), (0, _SLAB_W - c)))

    blocks = []

    def add(w1, b1, w2, b2):
        blocks.extend([blk(w1.T, 24), blk(b1.T, 24), blk(w2.T, 16), blk(b2.T, 16)])

    for l in range(NUM_LAYERS):
        add(w1f[l], b1f[l], w2f[l], b2f[l])
    for l in range(NUM_LAYERS - 1):
        add(vw1f[l], vb1f[l], vw2f[l], vb2f[l])
    blocks.append(blk(vn0.T, 16))                             # vn0 column
    slab = jnp.concatenate(blocks, axis=0).astype(jnp.float32)
    assert slab.shape == (_SLAB_ROWS, _SLAB_W)
    return slab


@functools.partial(jax.jit, static_argnames=("num_graphs",))
def subgraph_model_forward(eps_gin, h0, edge_emb, edge_index, batch, vn0,
                           w1, b1, bn1, w2, b2, bn2,
                           vw1, vb1, vbn1, vw2, vb2, vbn2, *, num_graphs):
    # ---- trace-time preprocessing (pure XLA, done once per compile) ----
    w1f, b1f = _fold_bn(w1, b1, bn1)
    w2f, b2f = _fold_bn(w2, b2, bn2)
    vw1f, vb1f = _fold_bn(vw1, vb1, vbn1)
    vw2f, vb2f = _fold_bn(vw2, vb2, vbn2)
    params = _pack_params(w1f, b1f, w2f, b2f, vw1f, vb1f, vw2f, vb2f, vn0)

    # lane-dense layouts: node/edge axes go on the 128-lane axis
    h0_t = jnp.transpose(h0).astype(jnp.float32)                        # [D, N]
    edge_emb_t = jnp.transpose(edge_emb, (0, 2, 1)).astype(jnp.float32)  # [L, D, E]

    src_row = edge_index[0:1, :].astype(jnp.int32)                      # [1, E]
    dst_col = jnp.transpose(edge_index[1:2, :]).astype(jnp.int32)       # [E, 1]
    batch_row = batch[None, :].astype(jnp.int32)                        # [1, N]
    batch_col = batch[:, None].astype(jnp.int32)                        # [N, 1]

    vmem_args = (h0_t, src_row, dst_col, batch_row, batch_col, edge_emb_t, params)

    N, D = h0.shape
    E = edge_index.shape[1]
    G = num_graphs

    # VMEM budget from the actual footprint: inputs (x2 for Pallas buffering)
    # + in-kernel f32 temporaries (masks + activations), clamped to the
    # physical VMEM of the current chip generation.
    in_bytes = sum(int(a.size) * a.dtype.itemsize for a in vmem_args)
    temp_bytes = 4 * (2 * E * N + 2 * G * N
                      + 8 * (EMB_DIM + HID_DIM) * (N + E + G))
    try:
        phys = int(pltpu.get_tpu_info().vmem_capacity_bytes)
    except Exception:
        phys = 64 * 1024 * 1024
    vmem_budget = int(min(max(2 * in_bytes + temp_bytes + (1 << 20), 4 << 20),
                          (phys * 7) // 8))

    vmem = pl.BlockSpec(memory_space=pltpu.MemorySpace.VMEM)
    smem = pl.BlockSpec(memory_space=pltpu.MemorySpace.SMEM)
    out = pl.pallas_call(
        functools.partial(subgraph_gnn_kernel, num_graphs=G),
        out_shape=jax.ShapeDtypeStruct((D, 1), jnp.float32),
        in_specs=[smem] + [vmem] * len(vmem_args),
        out_specs=vmem,
        compiler_params=pltpu.CompilerParams(vmem_limit_bytes=vmem_budget),
    )(eps_gin, *vmem_args)
    return jnp.transpose(out)                                           # [1, D]


def reference_forward(eps_gin, h0, edge_emb, edge_index, batch, vn0,
                      w1, b1, bn1, w2, b2, bn2,
                      vw1, vb1, vbn1, vw2, vb2, vbn2, *, num_graphs):
    hp = jax.lax.Precision.HIGHEST

    def bn(x, p):
        return (x - p[2]) * p[0] / jnp.sqrt(p[3] + BN_EPS) + p[1]

    def dot(a, b):
        return jnp.dot(a, b, precision=hp)

    N = h0.shape[0]
    G = num_graphs
    src_onehot = jax.nn.one_hot(edge_index[0], N, dtype=jnp.float32)     # [E, N]
    dst_scatter = jax.nn.one_hot(edge_index[1], N, dtype=jnp.float32).T  # [N, E]
    pool_mat = jax.nn.one_hot(batch, G, dtype=jnp.float32).T             # [G, N]

    h = h0
    vn = jnp.tile(vn0, (G, 1))                                           # [G, D]
    for layer in range(NUM_LAYERS):
        h_in = h + dot(pool_mat.T, vn)
        msg = jnp.maximum(dot(src_onehot, h_in) + edge_emb[layer], 0.0)
        aggr = dot(dst_scatter, msg)
        z = (1.0 + eps_gin[layer]) * h_in + aggr
        z = jnp.maximum(bn(dot(z, w1[layer]) + b1[layer], bn1[layer]), 0.0)
        z = dot(z, w2[layer]) + b2[layer]
        h = bn(z, bn2[layer])
        if layer < NUM_LAYERS - 1:
            h = jnp.maximum(h, 0.0)
        h = h + h_in
        if layer < NUM_LAYERS - 1:
            vn_tmp = dot(pool_mat, h_in) + vn
            t = jnp.maximum(bn(dot(vn_tmp, vw1[layer]) + vb1[layer], vbn1[layer]), 0.0)
            t = jnp.maximum(bn(dot(t, vw2[layer]) + vb2[layer], vbn2[layer]), 0.0)
            vn = vn + t
    pooled = dot(pool_mat, h)
    return jnp.sum(pooled, axis=0, keepdims=True)


if __name__ == "__main__":
    D, H, L = EMB_DIM, HID_DIM, NUM_LAYERS

    # ---- synthetic batch: 2 ring graphs of 6 nodes each (PyG-style Batch) ----
    nodes_per_graph, G = 6, 2
    N = G * nodes_per_graph
    src_list, dst_list = [], []
    for g in range(G):
        off = g * nodes_per_graph
        for i in range(nodes_per_graph):
            a, b = off + i, off + (i + 1) % nodes_per_graph
            src_list += [a, b]
            dst_list += [b, a]
    edge_index = jnp.array([src_list, dst_list], dtype=jnp.int32)        # [2, E]
    E = edge_index.shape[1]
    batch = jnp.repeat(jnp.arange(G, dtype=jnp.int32), nodes_per_graph)  # [N]

    key = jax.random.PRNGKey(0)
    keys = iter(jax.random.split(key, 64))

    ATOM_FEATS, BOND_FEATS, VOCAB = 9, 3, 8
    x_feat = jax.random.randint(next(keys), (N, ATOM_FEATS), 0, VOCAB)
    e_feat = jax.random.randint(next(keys), (E, BOND_FEATS), 0, VOCAB)

    atom_tables = 0.1 * jax.random.normal(next(keys), (ATOM_FEATS, VOCAB, D), jnp.float32)
    bond_tables = 0.1 * jax.random.normal(next(keys), (L, BOND_FEATS, VOCAB, D), jnp.float32)

    # AtomEncoder / BondEncoder embedding lookups (glue, outside the kernel)
    h0 = jnp.zeros((N, D), jnp.float32)
    for f in range(ATOM_FEATS):
        h0 = h0 + atom_tables[f][x_feat[:, f]]
    edge_emb = jnp.zeros((L, E, D), jnp.float32)
    for l in range(L):
        ee = jnp.zeros((E, D), jnp.float32)
        for f in range(BOND_FEATS):
            ee = ee + bond_tables[l, f][e_feat[:, f]]
        edge_emb = edge_emb.at[l].set(ee)

    def bn_params(n_layers, dim):
        # rows: gamma, beta, running_mean, running_var
        return jnp.stack(
            [jnp.ones((n_layers, dim)), jnp.zeros((n_layers, dim)),
             0.01 * jnp.ones((n_layers, dim)), 1.1 * jnp.ones((n_layers, dim))],
            axis=1).astype(jnp.float32)

    w1 = 0.1 * jax.random.normal(next(keys), (L, D, H), jnp.float32)
    b1 = 0.05 * jax.random.normal(next(keys), (L, 1, H), jnp.float32)
    bn1 = bn_params(L, H)
    w2 = 0.1 * jax.random.normal(next(keys), (L, H, D), jnp.float32)
    b2 = 0.05 * jax.random.normal(next(keys), (L, 1, D), jnp.float32)
    bn2 = bn_params(L, D)
    vw1 = 0.1 * jax.random.normal(next(keys), (L - 1, D, H), jnp.float32)
    vb1 = 0.05 * jax.random.normal(next(keys), (L - 1, 1, H), jnp.float32)
    vbn1 = bn_params(L - 1, H)
    vw2 = 0.1 * jax.random.normal(next(keys), (L - 1, H, D), jnp.float32)
    vb2 = 0.05 * jax.random.normal(next(keys), (L - 1, 1, D), jnp.float32)
    vbn2 = bn_params(L - 1, D)
    eps_gin = jnp.zeros((L,), jnp.float32)          # GINConv eps init
    # virtual-node embedding weight (zero at init in torch, nonzero when trained;
    # nonzero here to exercise the general path)
    vn0 = 0.1 * jax.random.normal(next(keys), (1, D), jnp.float32)

    args = (eps_gin, h0, edge_emb, edge_index, batch, vn0,
            w1, b1, bn1, w2, b2, bn2, vw1, vb1, vbn1, vw2, vb2, vbn2)

    out = subgraph_model_forward(*args, num_graphs=G)
    out = jax.block_until_ready(out)
    assert out.shape == (1, D)

    ref = jax.block_until_ready(reference_forward(*args, num_graphs=G))
    np.testing.assert_allclose(np.asarray(out), np.asarray(ref), rtol=2e-3, atol=2e-3)

    print("KERNEL_OK")
</pallas_src>

<mosaic_0001>
module attributes {stable_mosaic.version = 11 : i64} {
  func.func @subgraph_gnn_kernel(%arg0: memref<3xf32, #tpu.memory_space<smem>>, %arg1: memref<9x12xf32, #tpu.memory_space<vmem>>, %arg2: memref<1x24xi32, #tpu.memory_space<vmem>>, %arg3: memref<24x1xi32, #tpu.memory_space<vmem>>, %arg4: memref<1x12xi32, #tpu.memory_space<vmem>>, %arg5: memref<12x1xi32, #tpu.memory_space<vmem>>, %arg6: memref<3x9x24xf32, #tpu.memory_space<vmem>>, %arg7: memref<416x18xf32, #tpu.memory_space<vmem>>, %arg8: memref<9x1xf32, #tpu.memory_space<vmem>>) attributes {dimension_semantics = [], scalar_prefetch = 0 : i64, scratch_operands = 0 : i64, tpu.core_type = #tpu.core_type<tc>} {
    %c0 = arith.constant 0 : index
    %c0_0 = arith.constant 0 : index
    %0 = vector.load %arg1[%c0, %c0_0] : memref<9x12xf32, #tpu.memory_space<vmem>>, vector<9x12xf32>
    %c0_1 = arith.constant 0 : index
    %c0_2 = arith.constant 0 : index
    %1 = vector.load %arg7[%c0_1, %c0_2] : memref<416x18xf32, #tpu.memory_space<vmem>>, vector<416x18xf32>
    %2 = tpu.iota {dimensions = array<i32: 0>} : vector<12x24xi32>
    %c0_3 = arith.constant 0 : index
    %c0_4 = arith.constant 0 : index
    %3 = vector.load %arg2[%c0_3, %c0_4] : memref<1x24xi32, #tpu.memory_space<vmem>>, vector<1x24xi32>
    %4 = vector.broadcast %3 : vector<1x24xi32> to vector<12x24xi32>
    %5 = arith.cmpi eq, %2, %4 : vector<12x24xi32>
    %6 = arith.extui %5 : vector<12x24xi1> to vector<12x24xi32>
    %7 = arith.sitofp %6 : vector<12x24xi32> to vector<12x24xf32>
    %8 = tpu.iota {dimensions = array<i32: 1>} : vector<24x12xi32>
    %c0_5 = arith.constant 0 : index
    %c0_6 = arith.constant 0 : index
    %9 = vector.load %arg3[%c0_5, %c0_6] : memref<24x1xi32, #tpu.memory_space<vmem>>, vector<24x1xi32>
    %10 = vector.broadcast %9 : vector<24x1xi32> to vector<24x12xi32>
    %11 = arith.cmpi eq, %8, %10 : vector<24x12xi32>
    %12 = arith.extui %11 : vector<24x12xi1> to vector<24x12xi32>
    %13 = arith.sitofp %12 : vector<24x12xi32> to vector<24x12xf32>
    %14 = tpu.iota {dimensions = array<i32: 0>} : vector<2x12xi32>
    %c0_7 = arith.constant 0 : index
    %c0_8 = arith.constant 0 : index
    %15 = vector.load %arg4[%c0_7, %c0_8] : memref<1x12xi32, #tpu.memory_space<vmem>>, vector<1x12xi32>
    %16 = vector.broadcast %15 : vector<1x12xi32> to vector<2x12xi32>
    %17 = arith.cmpi eq, %14, %16 : vector<2x12xi32>
    %18 = arith.extui %17 : vector<2x12xi1> to vector<2x12xi32>
    %19 = arith.sitofp %18 : vector<2x12xi32> to vector<2x12xf32>
    %20 = tpu.iota {dimensions = array<i32: 1>} : vector<12x2xi32>
    %c0_9 = arith.constant 0 : index
    %c0_10 = arith.constant 0 : index
    %21 = vector.load %arg5[%c0_9, %c0_10] : memref<12x1xi32, #tpu.memory_space<vmem>>, vector<12x1xi32>
    %22 = vector.broadcast %21 : vector<12x1xi32> to vector<12x2xi32>
    %23 = arith.cmpi eq, %20, %22 : vector<12x2xi32>
    %24 = arith.extui %23 : vector<12x2xi1> to vector<12x2xi32>
    %25 = arith.sitofp %24 : vector<12x2xi32> to vector<12x2xf32>
    %26 = vector.extract_strided_slice %1 {offsets = [400, 0], sizes = [9, 1], strides = [1, 1]} : vector<416x18xf32> to vector<9x1xf32>
    %27 = vector.shape_cast %26 : vector<9x1xf32> to vector<9x1xf32>
    %28 = vector.broadcast %27 : vector<9x1xf32> to vector<9x2xf32>
    %cst = arith.constant dense<0.000000e+00> : vector<9x12xf32>
    %29 = tpu.matmul %28, %19, %cst {dimension_numbers = #tpu.dot_dimension_numbers<[1], [0], [0], [1], [0, 0, 1, 1], [], []>} : vector<9x2xf32>, vector<2x12xf32>, vector<9x12xf32> -> vector<9x12xf32>
    %30 = arith.addf %0, %29 : vector<9x12xf32>
    %cst_11 = arith.constant dense<0.000000e+00> : vector<9x24xf32>
    %31 = tpu.matmul %30, %7, %cst_11 {dimension_numbers = #tpu.dot_dimension_numbers<[1], [0], [0], [1], [0, 0, 1, 1], [], []>} : vector<9x12xf32>, vector<12x24xf32>, vector<9x24xf32> -> vector<9x24xf32>
    %c0_12 = arith.constant 0 : index
    %c0_13 = arith.constant 0 : index
    %c0_14 = arith.constant 0 : index
    %32 = vector.load %arg6[%c0_12, %c0_13, %c0_14] : memref<3x9x24xf32, #tpu.memory_space<vmem>>, vector<1x9x24xf32>
    %33 = vector.shape_cast %32 : vector<1x9x24xf32> to vector<9x24xf32>
    %34 = arith.addf %31, %33 : vector<9x24xf32>
    %cst_15 = arith.constant 0.000000e+00 : f32
    %35 = vector.broadcast %cst_15 : f32 to vector<9x24xf32>
    %36 = arith.maximumf %34, %35 : vector<9x24xf32>
    %cst_16 = arith.constant dense<0.000000e+00> : vector<9x12xf32>
    %37 = tpu.matmul %36, %13, %cst_16 {dimension_numbers = #tpu.dot_dimension_numbers<[1], [0], [0], [1], [0, 0, 1, 1], [], []>} : vector<9x24xf32>, vector<24x12xf32>, vector<9x12xf32> -> vector<9x12xf32>
    %c0_17 = arith.constant 0 : index
    %38 = memref.load %arg0[%c0_17] : memref<3xf32, #tpu.memory_space<smem>>
    %cst_18 = arith.constant 1.000000e+00 : f32
    %39 = arith.addf %cst_18, %38 : f32
    %40 = vector.broadcast %39 : f32 to vector<9x12xf32>
    %41 = arith.mulf %40, %30 : vector<9x12xf32>
    %42 = arith.addf %41, %37 : vector<9x12xf32>
    %43 = vector.extract_strided_slice %1 {offsets = [0, 0], sizes = [18, 9], strides = [1, 1]} : vector<416x18xf32> to vector<18x9xf32>
    %44 = vector.extract_strided_slice %1 {offsets = [24, 0], sizes = [18, 1], strides = [1, 1]} : vector<416x18xf32> to vector<18x1xf32>
    %45 = vector.extract_strided_slice %1 {offsets = [48, 0], sizes = [9, 18], strides = [1, 1]} : vector<416x18xf32> to vector<9x18xf32>
    %46 = vector.extract_strided_slice %1 {offsets = [64, 0], sizes = [9, 1], strides = [1, 1]} : vector<416x18xf32> to vector<9x1xf32>
    %cst_19 = arith.constant dense<0.000000e+00> : vector<18x12xf32>
    %47 = tpu.matmul %43, %42, %cst_19 {dimension_numbers = #tpu.dot_dimension_numbers<[1], [0], [0], [1], [0, 0, 1, 1], [], []>} : vector<18x9xf32>, vector<9x12xf32>, vector<18x12xf32> -> vector<18x12xf32>
    %48 = vector.broadcast %44 : vector<18x1xf32> to vector<18x12xf32>
    %49 = arith.addf %47, %48 : vector<18x12xf32>
    %cst_20 = arith.constant 0.000000e+00 : f32
    %50 = vector.broadcast %cst_20 : f32 to vector<18x12xf32>
    %51 = arith.maximumf %49, %50 : vector<18x12xf32>
    %cst_21 = arith.constant dense<0.000000e+00> : vector<9x12xf32>
    %52 = tpu.matmul %45, %51, %cst_21 {dimension_numbers = #tpu.dot_dimension_numbers<[1], [0], [0], [1], [0, 0, 1, 1], [], []>} : vector<9x18xf32>, vector<18x12xf32>, vector<9x12xf32> -> vector<9x12xf32>
    %53 = vector.broadcast %46 : vector<9x1xf32> to vector<9x12xf32>
    %54 = arith.addf %52, %53 : vector<9x12xf32>
    %cst_22 = arith.constant 0.000000e+00 : f32
    %55 = vector.broadcast %cst_22 : f32 to vector<9x12xf32>
    %56 = arith.maximumf %54, %55 : vector<9x12xf32>
    %57 = arith.addf %56, %30 : vector<9x12xf32>
    %cst_23 = arith.constant dense<0.000000e+00> : vector<9x2xf32>
    %58 = tpu.matmul %30, %25, %cst_23 {dimension_numbers = #tpu.dot_dimension_numbers<[1], [0], [0], [1], [0, 0, 1, 1], [], []>} : vector<9x12xf32>, vector<12x2xf32>, vector<9x2xf32> -> vector<9x2xf32>
    %59 = arith.addf %58, %28 : vector<9x2xf32>
    %60 = vector.extract_strided_slice %1 {offsets = [240, 0], sizes = [18, 9], strides = [1, 1]} : vector<416x18xf32> to vector<18x9xf32>
    %61 = vector.extract_strided_slice %1 {offsets = [264, 0], sizes = [18, 1], strides = [1, 1]} : vector<416x18xf32> to vector<18x1xf32>
    %62 = vector.extract_strided_slice %1 {offsets = [288, 0], sizes = [9, 18], strides = [1, 1]} : vector<416x18xf32> to vector<9x18xf32>
    %63 = vector.extract_strided_slice %1 {offsets = [304, 0], sizes = [9, 1], strides = [1, 1]} : vector<416x18xf32> to vector<9x1xf32>
    %cst_24 = arith.constant dense<0.000000e+00> : vector<18x2xf32>
    %64 = tpu.matmul %60, %59, %cst_24 {dimension_numbers = #tpu.dot_dimension_numbers<[1], [0], [0], [1], [0, 0, 1, 1], [], []>} : vector<18x9xf32>, vector<9x2xf32>, vector<18x2xf32> -> vector<18x2xf32>
    %65 = vector.broadcast %61 : vector<18x1xf32> to vector<18x2xf32>
    %66 = arith.addf %64, %65 : vector<18x2xf32>
    %cst_25 = arith.constant 0.000000e+00 : f32
    %67 = vector.broadcast %cst_25 : f32 to vector<18x2xf32>
    %68 = arith.maximumf %66, %67 : vector<18x2xf32>
    %cst_26 = arith.constant dense<0.000000e+00> : vector<9x2xf32>
    %69 = tpu.matmul %62, %68, %cst_26 {dimension_numbers = #tpu.dot_dimension_numbers<[1], [0], [0], [1], [0, 0, 1, 1], [], []>} : vector<9x18xf32>, vector<18x2xf32>, vector<9x2xf32> -> vector<9x2xf32>
    %70 = vector.broadcast %63 : vector<9x1xf32> to vector<9x2xf32>
    %71 = arith.addf %69, %70 : vector<9x2xf32>
    %cst_27 = arith.constant 0.000000e+00 : f32
    %72 = vector.broadcast %cst_27 : f32 to vector<9x2xf32>
    %73 = arith.maximumf %71, %72 : vector<9x2xf32>
    %74 = arith.addf %28, %73 : vector<9x2xf32>
    %cst_28 = arith.constant dense<0.000000e+00> : vector<9x12xf32>
    %75 = tpu.matmul %74, %19, %cst_28 {dimension_numbers = #tpu.dot_dimension_numbers<[1], [0], [0], [1], [0, 0, 1, 1], [], []>} : vector<9x2xf32>, vector<2x12xf32>, vector<9x12xf32> -> vector<9x12xf32>
    %76 = arith.addf %57, %75 : vector<9x12xf32>
    %cst_29 = arith.constant dense<0.000000e+00> : vector<9x24xf32>
    %77 = tpu.matmul %76, %7, %cst_29 {dimension_numbers = #tpu.dot_dimension_numbers<[1], [0], [0], [1], [0, 0, 1, 1], [], []>} : vector<9x12xf32>, vector<12x24xf32>, vector<9x24xf32> -> vector<9x24xf32>
    %c1 = arith.constant 1 : index
    %c0_30 = arith.constant 0 : index
    %c0_31 = arith.constant 0 : index
    %78 = vector.load %arg6[%c1, %c0_30, %c0_31] : memref<3x9x24xf32, #tpu.memory_space<vmem>>, vector<1x9x24xf32>
    %79 = vector.shape_cast %78 : vector<1x9x24xf32> to vector<9x24xf32>
    %80 = arith.addf %77, %79 : vector<9x24xf32>
    %cst_32 = arith.constant 0.000000e+00 : f32
    %81 = vector.broadcast %cst_32 : f32 to vector<9x24xf32>
    %82 = arith.maximumf %80, %81 : vector<9x24xf32>
    %cst_33 = arith.constant dense<0.000000e+00> : vector<9x12xf32>
    %83 = tpu.matmul %82, %13, %cst_33 {dimension_numbers = #tpu.dot_dimension_numbers<[1], [0], [0], [1], [0, 0, 1, 1], [], []>} : vector<9x24xf32>, vector<24x12xf32>, vector<9x12xf32> -> vector<9x12xf32>
    %c1_34 = arith.constant 1 : index
    %84 = memref.load %arg0[%c1_34] : memref<3xf32, #tpu.memory_space<smem>>
    %cst_35 = arith.constant 1.000000e+00 : f32
    %85 = arith.addf %cst_35, %84 : f32
    %86 = vector.broadcast %85 : f32 to vector<9x12xf32>
    %87 = arith.mulf %86, %76 : vector<9x12xf32>
    %88 = arith.addf %87, %83 : vector<9x12xf32>
    %89 = vector.extract_strided_slice %1 {offsets = [80, 0], sizes = [18, 9], strides = [1, 1]} : vector<416x18xf32> to vector<18x9xf32>
    %90 = vector.extract_strided_slice %1 {offsets = [104, 0], sizes = [18, 1], strides = [1, 1]} : vector<416x18xf32> to vector<18x1xf32>
    %91 = vector.extract_strided_slice %1 {offsets = [128, 0], sizes = [9, 18], strides = [1, 1]} : vector<416x18xf32> to vector<9x18xf32>
    %92 = vector.extract_strided_slice %1 {offsets = [144, 0], sizes = [9, 1], strides = [1, 1]} : vector<416x18xf32> to vector<9x1xf32>
    %cst_36 = arith.constant dense<0.000000e+00> : vector<18x12xf32>
    %93 = tpu.matmul %89, %88, %cst_36 {dimension_numbers = #tpu.dot_dimension_numbers<[1], [0], [0], [1], [0, 0, 1, 1], [], []>} : vector<18x9xf32>, vector<9x12xf32>, vector<18x12xf32> -> vector<18x12xf32>
    %94 = vector.broadcast %90 : vector<18x1xf32> to vector<18x12xf32>
    %95 = arith.addf %93, %94 : vector<18x12xf32>
    %cst_37 = arith.constant 0.000000e+00 : f32
    %96 = vector.broadcast %cst_37 : f32 to vector<18x12xf32>
    %97 = arith.maximumf %95, %96 : vector<18x12xf32>
    %cst_38 = arith.constant dense<0.000000e+00> : vector<9x12xf32>
    %98 = tpu.matmul %91, %97, %cst_38 {dimension_numbers = #tpu.dot_dimension_numbers<[1], [0], [0], [1], [0, 0, 1, 1], [], []>} : vector<9x18xf32>, vector<18x12xf32>, vector<9x12xf32> -> vector<9x12xf32>
    %99 = vector.broadcast %92 : vector<9x1xf32> to vector<9x12xf32>
    %100 = arith.addf %98, %99 : vector<9x12xf32>
    %cst_39 = arith.constant 0.000000e+00 : f32
    %101 = vector.broadcast %cst_39 : f32 to vector<9x12xf32>
    %102 = arith.maximumf %100, %101 : vector<9x12xf32>
    %103 = arith.addf %102, %76 : vector<9x12xf32>
    %cst_40 = arith.constant dense<0.000000e+00> : vector<9x2xf32>
    %104 = tpu.matmul %76, %25, %cst_40 {dimension_numbers = #tpu.dot_dimension_numbers<[1], [0], [0], [1], [0, 0, 1, 1], [], []>} : vector<9x12xf32>, vector<12x2xf32>, vector<9x2xf32> -> vector<9x2xf32>
    %105 = arith.addf %104, %74 : vector<9x2xf32>
    %106 = vector.extract_strided_slice %1 {offsets = [320, 0], sizes = [18, 9], strides = [1, 1]} : vector<416x18xf32> to vector<18x9xf32>
    %107 = vector.extract_strided_slice %1 {offsets = [344, 0], sizes = [18, 1], strides = [1, 1]} : vector<416x18xf32> to vector<18x1xf32>
    %108 = vector.extract_strided_slice %1 {offsets = [368, 0], sizes = [9, 18], strides = [1, 1]} : vector<416x18xf32> to vector<9x18xf32>
    %109 = vector.extract_strided_slice %1 {offsets = [384, 0], sizes = [9, 1], strides = [1, 1]} : vector<416x18xf32> to vector<9x1xf32>
    %cst_41 = arith.constant dense<0.000000e+00> : vector<18x2xf32>
    %110 = tpu.matmul %106, %105, %cst_41 {dimension_numbers = #tpu.dot_dimension_numbers<[1], [0], [0], [1], [0, 0, 1, 1], [], []>} : vector<18x9xf32>, vector<9x2xf32>, vector<18x2xf32> -> vector<18x2xf32>
    %111 = vector.broadcast %107 : vector<18x1xf32> to vector<18x2xf32>
    %112 = arith.addf %110, %111 : vector<18x2xf32>
    %cst_42 = arith.constant 0.000000e+00 : f32
    %113 = vector.broadcast %cst_42 : f32 to vector<18x2xf32>
    %114 = arith.maximumf %112, %113 : vector<18x2xf32>
    %cst_43 = arith.constant dense<0.000000e+00> : vector<9x2xf32>
    %115 = tpu.matmul %108, %114, %cst_43 {dimension_numbers = #tpu.dot_dimension_numbers<[1], [0], [0], [1], [0, 0, 1, 1], [], []>} : vector<9x18xf32>, vector<18x2xf32>, vector<9x2xf32> -> vector<9x2xf32>
    %116 = vector.broadcast %109 : vector<9x1xf32> to vector<9x2xf32>
    %117 = arith.addf %115, %116 : vector<9x2xf32>
    %cst_44 = arith.constant 0.000000e+00 : f32
    %118 = vector.broadcast %cst_44 : f32 to vector<9x2xf32>
    %119 = arith.maximumf %117, %118 : vector<9x2xf32>
    %120 = arith.addf %74, %119 : vector<9x2xf32>
    %cst_45 = arith.constant dense<0.000000e+00> : vector<9x12xf32>
    %121 = tpu.matmul %120, %19, %cst_45 {dimension_numbers = #tpu.dot_dimension_numbers<[1], [0], [0], [1], [0, 0, 1, 1], [], []>} : vector<9x2xf32>, vector<2x12xf32>, vector<9x12xf32> -> vector<9x12xf32>
    %122 = arith.addf %103, %121 : vector<9x12xf32>
    %cst_46 = arith.constant dense<0.000000e+00> : vector<9x24xf32>
    %123 = tpu.matmul %122, %7, %cst_46 {dimension_numbers = #tpu.dot_dimension_numbers<[1], [0], [0], [1], [0, 0, 1, 1], [], []>} : vector<9x12xf32>, vector<12x24xf32>, vector<9x24xf32> -> vector<9x24xf32>
    %c2 = arith.constant 2 : index
    %c0_47 = arith.constant 0 : index
    %c0_48 = arith.constant 0 : index
    %124 = vector.load %arg6[%c2, %c0_47, %c0_48] : memref<3x9x24xf32, #tpu.memory_space<vmem>>, vector<1x9x24xf32>
    %125 = vector.shape_cast %124 : vector<1x9x24xf32> to vector<9x24xf32>
    %126 = arith.addf %123, %125 : vector<9x24xf32>
    %cst_49 = arith.constant 0.000000e+00 : f32
    %127 = vector.broadcast %cst_49 : f32 to vector<9x24xf32>
    %128 = arith.maximumf %126, %127 : vector<9x24xf32>
    %cst_50 = arith.constant dense<0.000000e+00> : vector<9x12xf32>
    %129 = tpu.matmul %128, %13, %cst_50 {dimension_numbers = #tpu.dot_dimension_numbers<[1], [0], [0], [1], [0, 0, 1, 1], [], []>} : vector<9x24xf32>, vector<24x12xf32>, vector<9x12xf32> -> vector<9x12xf32>
    %c2_51 = arith.constant 2 : index
    %130 = memref.load %arg0[%c2_51] : memref<3xf32, #tpu.memory_space<smem>>
    %cst_52 = arith.constant 1.000000e+00 : f32
    %131 = arith.addf %cst_52, %130 : f32
    %132 = vector.broadcast %131 : f32 to vector<9x12xf32>
    %133 = arith.mulf %132, %122 : vector<9x12xf32>
    %134 = arith.addf %133, %129 : vector<9x12xf32>
    %135 = vector.extract_strided_slice %1 {offsets = [160, 0], sizes = [18, 9], strides = [1, 1]} : vector<416x18xf32> to vector<18x9xf32>
    %136 = vector.extract_strided_slice %1 {offsets = [184, 0], sizes = [18, 1], strides = [1, 1]} : vector<416x18xf32> to vector<18x1xf32>
    %137 = vector.extract_strided_slice %1 {offsets = [208, 0], sizes = [9, 18], strides = [1, 1]} : vector<416x18xf32> to vector<9x18xf32>
    %138 = vector.extract_strided_slice %1 {offsets = [224, 0], sizes = [9, 1], strides = [1, 1]} : vector<416x18xf32> to vector<9x1xf32>
    %cst_53 = arith.constant dense<0.000000e+00> : vector<18x12xf32>
    %139 = tpu.matmul %135, %134, %cst_53 {dimension_numbers = #tpu.dot_dimension_numbers<[1], [0], [0], [1], [0, 0, 1, 1], [], []>} : vector<18x9xf32>, vector<9x12xf32>, vector<18x12xf32> -> vector<18x12xf32>
    %140 = vector.broadcast %136 : vector<18x1xf32> to vector<18x12xf32>
    %141 = arith.addf %139, %140 : vector<18x12xf32>
    %cst_54 = arith.constant 0.000000e+00 : f32
    %142 = vector.broadcast %cst_54 : f32 to vector<18x12xf32>
    %143 = arith.maximumf %141, %142 : vector<18x12xf32>
    %cst_55 = arith.constant dense<0.000000e+00> : vector<9x12xf32>
    %144 = tpu.matmul %137, %143, %cst_55 {dimension_numbers = #tpu.dot_dimension_numbers<[1], [0], [0], [1], [0, 0, 1, 1], [], []>} : vector<9x18xf32>, vector<18x12xf32>, vector<9x12xf32> -> vector<9x12xf32>
    %145 = vector.broadcast %138 : vector<9x1xf32> to vector<9x12xf32>
    %146 = arith.addf %144, %145 : vector<9x12xf32>
    %147 = arith.addf %146, %122 : vector<9x12xf32>
    %cst_56 = arith.constant dense<0.000000e+00> : vector<9x2xf32>
    %148 = tpu.matmul %147, %25, %cst_56 {dimension_numbers = #tpu.dot_dimension_numbers<[1], [0], [0], [1], [0, 0, 1, 1], [], []>} : vector<9x12xf32>, vector<12x2xf32>, vector<9x2xf32> -> vector<9x2xf32>
    %cst_57 = arith.constant dense<0.000000e+00> : vector<9xf32>
    %149 = vector.multi_reduction <add>, %148, %cst_57 [1] : vector<9x2xf32> to vector<9xf32>
    %150 = vector.shape_cast %149 : vector<9xf32> to vector<9x1xf32>
    %c0_58 = arith.constant 0 : index
    %c0_59 = arith.constant 0 : index
    %151 = vector.load %arg8[%c0_58, %c0_59] : memref<9x1xf32, #tpu.memory_space<vmem>>, vector<9x1xf32>
    tpu.vector_store %arg8[%c0_58, %c0_59], %150 {strides = array<i32>} : memref<9x1xf32, #tpu.memory_space<vmem>>, vector<9x1xf32>,
    return
  }
}

</mosaic_0001>

<bundles_post_ra>
// kernel: subgraph_model_forward.1
= control target key start
LH: loop header
LB: loop body
LE: loop exit
PB: predicated region body
PF: predicated region fallthrough
CT: control target
= control target key end

     0   :  { %13 = vsyncpa [#allocation3], 0  ;;  %s3301_s0 = inlined_call_operand.vmem [shape: f32[3], index: 0, kind: input, shape index: {}]   ;;  %s3302_s1 = inlined_call_operand.vmem [shape: f32[9,12], index: 1, kind: input, shape index: {}]   ;;  %s3303_s2 = inlined_call_operand.vmem [shape: s32[1,24], index: 2, kind: input, shape index: {}]   ;;  %s3304_s3 = inlined_call_operand.vmem [shape: s32[24,1], index: 3, kind: input, shape index: {}]   ;;  %s3305_s4 = inlined_call_operand.vmem [shape: s32[1,12], index: 4, kind: input, shape index: {}]   ;;  %s3306_s5 = inlined_call_operand.vmem [shape: s32[12,1], index: 5, kind: input, shape index: {}]   ;;  %s3307_s6 = inlined_call_operand.vmem [shape: f32[3,9,24], index: 6, kind: input, shape index: {}]   ;;  %s3308_s7 = inlined_call_operand.vmem [shape: f32[416,18], index: 7, kind: input, shape index: {}]   ;;  %s3309_s8 = inlined_call_operand.vmem [shape: f32[9,1], index: 8, kind: output, shape index: {}]  }
   0x1   :  { %s20_s29 = sshll.u32 %s3301_s0, 4  ;;  %s21_s29 = int_to_ptr.vmem [resolvable:$true] %s20_s29 }
   0x2   :  { %s2724_s30 = scalar_lea.vmem %s21_s29, 16  ;;  %p2729_p1 = scmp.lt.s32.totalorder %s21_s29, %s21_s29 }
   0x3   :  { %p2725_p0 = scmp.ne.s32.totalorder %s21_s29, %s2724_s30  ;;  %p2730_p2 = scmp.lt.s32.totalorder %s2724_s30, %s2724_s30 }
   0x5   :  { %p2731_p3 = por %p2730_p2, %p2729_p1 }
   0x7   :  { %p2732_p4 = pnand %p2731_p3, %p2725_p0 }
   0x9   :  { %2735 = shalt.err (!%p2732_p4)
}
   0xa   :  { %s2738_s9 = smov [#allocation2]  }
   0xb   :  { %23 = dma.vmem_to_smem %s21_s29, 16, %s2738_s9, [#allocation3]  }
   0xc   :  { %2736 = dma.done.wait [#allocation3], 16  }
   0xd   :  { %2737 = vsyncadd [#allocation3], 4294967280 }
   0xe   :  { %41 = sfence }
   0xf   :  { %v112_v0 = vld [vmem:[%s3304_s3] sm:$0xff]  ;;  %v94_v1 = vld [vmem:[%s3308_s7 + $0x190] sm:$0xff]  ;;  %v96_v2 = vlaneseq  ;;  %v2739_v3 = vmov 0   ;;  %v113_v4 = vld [vmem:[%s3304_s3 + $0x8] sm:$0xff]  ;;  %vm170_vm0 = vcmask 1041408   ;;  %v2740_v9 = vmov 0.0  }
  0x10   :  { %2723 = vset.pattern.permute.xlu1 %v2739_v3  ;;  %2722 = vset.pattern.permute.xlu0 %v2739_v3  ;;  %v95_v5 = vld [vmem:[%s3308_s7 + $0x198] sm:$0xff]  ;;  %v2241_v7 = vld [vmem:[%s3305_s4] ss:$0 sm:$0xff]  ;;  %v114_v8 = vld [vmem:[%s3304_s3 + $0x10] sm:$0xff]  ;;  %vm165_vm2 = vcmask 15360   ;;  %v2742_v33 = vmov 1.0  }
  0x11   :  { %116 = vperm.xlu1 %2723, %v112_v0   ;;  %157 = vperm.xlu0 %2722, %v94_v1   ;;  %v2806_v6 = vshrl.u32 %v96_v2, 7  ;;  %v48_v11 = vld [vmem:[%s3308_s7 + $0x20] sm:$0xff]  ;;  %v142_v12 = vld [vmem:[%s3306_s5 + $0x8] sm:$0xf]  ;;  %v79_v14 = vld [vmem:[%s3308_s7 + $0x118] sm:$0xff]  ;;  %v2861_v24 = vand.u32 127, %v96_v2 }
  0x12   :  { %v77_v13 = vld [vmem:[%s3308_s7 + $0x108] sm:$0xff]  ;;  %v83_v15 = vld [vmem:[%s3308_s7 + $0x138] sm:$0xff]  ;;  %v58_v17 = vld [vmem:[%s3308_s7 + $0x70] sm:$0xff]  ;;  %v2741_v30 = vmov 1.0|1.0   ;;  %vm260_vm9 = vcmask 1043456  }
  0x13   :  { %vm138_vm1 = vcmp.eq.s32.totalorder %v2806_v6, %v2241_v7  ;;  %v53_v16 = vld [vmem:[%s3308_s7 + $0x48] sm:$0xff]  ;;  %v87_v18 = vld [vmem:[%s3308_s7 + $0x158] sm:$0xff]  ;;  %v68_v22 = vld [vmem:[%s3308_s7 + $0xc0] sm:$0xff]  ;;  %v98_v34 = vadd.s32 8, %v2806_v6  ;;  %vm253_vm11 = vcmask 97280   ;;  %vm341_vm12 = vcmask 195584  }
  0x14   :  { %v2816_v10 = vsel %vm138_vm1, 1.0, %v2740_v9  ;;  %v89_v19 = vld [vmem:[%s3308_s7 + $0x168] sm:$0xff]  ;;  %v63_v21 = vld [vmem:[%s3308_s7 + $0x98] sm:$0xff]  ;;  %v72_v23 = vld [vmem:[%s3308_s7 + $0xe0] sm:$0xff]  ;;  %v2743_v3 = vmov 0.0|0.0   ;;  %vm2744_vm13 = vmmov 0  }
  0x15   :  { %119 = vperm.xlu1 %2723, %v113_v4   ;;  %162 = vperm.xlu0 %2722, %v95_v5   ;;  %v93_v20 = vld [vmem:[%s3308_s7 + $0x188] sm:$0xff]  ;;  %v2235_v35 = vld [vmem:[%s3303_s2] ss:$0 sm:$0xff]  ;;  %v47_v39 = vld [vmem:[%s3308_s7 + $0x18] sm:$0xff]  ;;  %vm455_vm14 = vcmask 1040384   ;;  %vm2745_vm15 = vmmov 1  }
  0x16   :  { %2432 = vmatprep.subr.msk.mxu0 %vm170_vm0, %v2816_v10  ;;  %vm105_vm7 = vcmp.eq.s32.totalorder %v98_v34, %v2235_v35  ;;  %vm104_vm8 = vcmp.eq.s32.totalorder %v2806_v6, %v2235_v35  ;;  %v49_v40 = vld [vmem:[%s3308_s7 + $0x28] sm:$0xff]  ;;  %v141_v41 = vld [vmem:[%s3306_s5] sm:$0xff]  ;;  %v78_v42 = vld [vmem:[%s3308_s7 + $0x110] sm:$0xff]  ;;  %s2289_s28 = sld [smem:[#allocation2 + $0x1]]  ;;  %s2322_s26 = sld [smem:[#allocation2 + $0x2]] }
  0x17   :  { %2433 = vmatpush3.msk.msra.mxu0 %vm170_vm0, %v2816_v10  ;;  %v2237_v36 = vsel %vm105_vm7, 1.0, %v2740_v9  ;;  %vm2904_vm10 = vmpackc.low %vm260_vm9, %vm104_vm8  ;;  %v82_v43 = vld [vmem:[%s3308_s7 + $0x130] sm:$0xff]  ;;  %v52_v44 = vld [vmem:[%s3308_s7 + $0x40] sm:$0xff] }
  0x18   :  { %v2901_v37 = vpack.c.bf16 %v2237_v36, %v2742_v33  ;;  %v57_v45 = vld [vmem:[%s3308_s7 + $0x68] sm:$0xff]  ;;  %v59_v46 = vld [vmem:[%s3308_s7 + $0x78] sm:$0xff]  ;;  %v88_v47 = vld [vmem:[%s3308_s7 + $0x160] sm:$0xff] }
  0x19   :  { %122 = vperm.xlu0 %2722, %v114_v8   ;;  %432 = vperm.xlu1 %2723, %v47_v39   ;;  %v92_v48 = vld [vmem:[%s3308_s7 + $0x180] sm:$0xff]  ;;  %v62_v49 = vld [vmem:[%s3308_s7 + $0x90] sm:$0xff]  ;;  %v67_v50 = vld [vmem:[%s3308_s7 + $0xb8] sm:$0xff] }
  0x1a   :  { %2628 = vmatprep.subr.msk.bf16.mxu1 %vm2904_vm10, %v2901_v37  ;;  %v69_v51 = vld [vmem:[%s3308_s7 + $0xc8] sm:$0xff]  ;;  %v42_v53 = vld [vmem:[%s3302_s1] sm:$0xff]  ;;  %vm2983_vm1 = vmpackc.low %vm455_vm14, %vm2745_vm15 }
  0x1b   :  { %2631 = vmatpush3.bf16.msk.msra.mxu1 %vm2904_vm10, %v2901_v37  ;;  %v73_v52 = vld [vmem:[%s3308_s7 + $0xe8] sm:$0xff]  ;;  %v251_v60 = vld [vmem:[%s3307_s6] sm:$0xff]  ;;  %v86_v29 = vld [vmem:[%s3308_s7 + $0x150] sm:$0xff] }
  0x1c   :  { %v43_v54 = vld [vmem:[%s3302_s1 + $0x8] sm:$0x1]  ;;  %2636 = vmatprep.subr.bf16.mxu1 %v2743_v3  ;;  %s423_s1 = sld [smem:[#allocation2]]  ;;  %s1178_s29 = sadd.f32 1.0, %s2289_s28 }
  0x1d   :  { %437 = vperm.xlu0 %2722, %v48_v11   ;;  %442 = vperm.xlu1 %2723, %v49_v40   ;;  %v252_v59 = vld [vmem:[%s3307_s6 + $0x8] sm:$0x1]  ;;  %s1926_s27 = sadd.f32 1.0, %s2322_s26 }
  0x21   :  { %147 = vperm.xlu0 %2722, %v142_v12   ;;  %144 = vperm.xlu1 %2723, %v141_v41  }
  0x22   :  { %s424_s30 = sadd.f32 1.0, %s423_s1 }
  0x24   :  { %v425_v4 = vstv %s424_s30 }
  0x25   :  { %721 = vperm.xlu0 %2722, %v77_v13   ;;  %726 = vperm.xlu1 %2723, %v78_v42   ;;  %v66_v13 = vld [vmem:[%s3308_s7 + $0xb0] sm:$0xff] }
  0x29   :  { %731 = vperm.xlu0 %2722, %v79_v14   ;;  %831 = vperm.xlu1 %2723, %v82_v43  }
  0x2d   :  { %836 = vperm.xlu0 %2722, %v83_v15   ;;  %544 = vperm.xlu1 %2723, %v52_v44   ;;  %v44_v15 = vld [vmem:[%s3308_s7] sm:$0xff] }
  0x31   :  { %549 = vperm.xlu0 %2722, %v53_v16   ;;  %1186 = vperm.xlu1 %2723, %v57_v45   ;;  %v45_v16 = vld [vmem:[%s3308_s7 + $0x8] sm:$0xff] }
  0x35   :  { %1191 = vperm.xlu0 %2722, %v58_v17   ;;  %1196 = vperm.xlu1 %2723, %v59_v46   ;;  %v46_v17 = vld [vmem:[%s3308_s7 + $0x10] sm:$0xff] }
  0x39   :  { %1469 = vperm.xlu0 %2722, %v87_v18   ;;  %1474 = vperm.xlu1 %2723, %v88_v47   ;;  %v50_v18 = vld [vmem:[%s3308_s7 + $0x30] sm:$0xff]  ;;  %v51_v47 = vld [vmem:[%s3308_s7 + $0x38] sm:$0xff] }
  0x3d   :  { %1479 = vperm.xlu0 %2722, %v89_v19   ;;  %1579 = vperm.xlu1 %2723, %v92_v48  }
  0x41   :  { %1584 = vperm.xlu0 %2722, %v93_v20   ;;  %1296 = vperm.xlu1 %2723, %v62_v49  }
  0x45   :  { %1301 = vperm.xlu0 %2722, %v63_v21   ;;  %1934 = vperm.xlu1 %2723, %v67_v50  }
  0x49   :  { %1939 = vperm.xlu0 %2722, %v68_v22   ;;  %1944 = vperm.xlu1 %2723, %v69_v51  }
  0x4d   :  { %2044 = vperm.xlu0 %2722, %v72_v23   ;;  %2049 = vperm.xlu1 %2723, %v73_v52  }
  0x90   :  { %v117_v25 = vpop.permute.xlu1 %116  ;;  %v2863_v26 = vpop.permute.xlu0 %157 }
  0x91   :  { %2434 = vmatprep.mubr.msk.f32.mxu0 %vm165_vm2, %v2863_v26  ;;  %vm124_vm3 = vcmp.eq.s32.totalorder %v2861_v24, %v117_v25 }
  0x94   :  { %v120_v27 = vpop.permute.xlu1 %119  ;;  %v2868_v28 = vpop.permute.xlu0 %162 }
  0x95   :  { %vm125_vm4 = vcmp.eq.s32.totalorder %v2861_v24, %v120_v27  ;;  %2435 = vmatmul.mubr.msk.f32.vlgmr.msra.gmra.mrb[0].mxu0 %vm165_vm2, %v2868_v28 }
  0x96   :  { %vm2873_vm5 = vmpackc.low %vm125_vm4, %vm124_vm3  ;;  %vm445_vm3 = vcmask 72704   ;;  %vm552_vm4 = vcmask 146432  }
  0x97   :  { %2633 = vmatprep.subr.msk.bf16.mxu0 %vm2873_vm5, %v2741_v30 }
  0x98   :  { %2635 = vmatpush3.bf16.msk.msra.mxu0 %vm2873_vm5, %v2741_v30  ;;  %v123_v31 = vpop.permute.xlu0 %122  ;;  %v433_v20 = vpop.permute.xlu1 %432 }
  0x99   :  { %vm2884_vm6 = vcmp.eq.s32.totalorder %v2861_v24, %v123_v31 }
  0x9a   :  { %2448 = vmatprep.subr.msk.mxu0 %vm2884_vm6, %v2742_v33 }
  0x9c   :  { %2449 = vmatpush3.msk.msra.mxu0 %vm2884_vm6, %v2742_v33  ;;  %v438_v19 = vpop.permute.xlu0 %437  ;;  %v443_v35 = vpop.permute.xlu1 %442 }
  0xa0   :  { %v148_v34 = vpop.permute.xlu0 %147  ;;  %v145_v46 = vpop.permute.xlu1 %144 }
  0xa1   :  { %vm150_vm7 = vcmp.eq.s32.totalorder %v2861_v24, %v148_v34  ;;  %vm149_vm8 = vcmp.eq.s32.totalorder %v2861_v24, %v145_v46 }
  0xa2   :  { %v2244_v45 = vsel %vm150_vm7, 1.0, %v2740_v9  ;;  %vm3023_vm14 = vmpackc.low %vm260_vm9, %vm149_vm8 }
  0xa3   :  { %v3020_v48 = vpack.c.bf16 %v2244_v45, %v2742_v33 }
 0x168   :  { %v2436_v55 = vpop.f32.mrb[0].mxu0 }
 0x169   :  { %v240_v56 = vpop.f32.mrb[1].mxu0  ;;  %v2964_v58 = vadd.f32 %v2436_v55, %v43_v54 }
 0x16a   :  { %v2962_v57 = vadd.f32 %v240_v56, %v42_v53  ;;  %v74_v56 = vld [vmem:[%s3308_s7 + $0xf0] sm:$0xff] }
 0x16b   :  { %v427_v5 = vmul.f32 %v425_v4, %v2964_v58 }
 0x16c   :  { %2441 = vmatprep.mubr.msk.f32.mxu1 %vm253_vm11, %v2962_v57  ;;  %v426_v7 = vmul.f32 %v425_v4, %v2962_v57 }
 0x16d   :  { %2442 = vmatmul.mubr.msk.f32.vlgmr.msra.gmra.mrb[0].mxu1 %vm253_vm11, %v2964_v58 }
 0x16e   :  { %2457 = vmatprep.mubr.msk.f32.mxu1 %vm2744_vm13, %v2740_v9 }
 0x240   :  { %v2443_v61 = vpop.f32.mrb[0].mxu1 }
 0x241   :  { %v336_v62 = vadd.f32 %v2443_v61, %v252_v59  ;;  %v330_v63 = vpop.f32.mrb[1].mxu1  ;;  %v75_v59 = vld [vmem:[%s3308_s7 + $0xf8] sm:$0xff]  ;;  %v80_v61 = vld [vmem:[%s3308_s7 + $0x120] sm:$0xff] }
 0x242   :  { %v331_v0 = vadd.f32 %v330_v63, %v251_v60  ;;  %v76_v60 = vld [vmem:[%s3308_s7 + $0x100] sm:$0xff] }
 0x243   :  { %v340_v2 = vmax.f32 %v336_v62, 0.0 }
 0x244   :  { %v339_v1 = vmax.f32 %v331_v0, 0.0  ;;  %v722_v0 = vpop.permute.xlu0 %721 }
 0x246   :  { %2450 = vmatprep.mubr.msk.f32.mxu0 %vm341_vm12, %v339_v1 }
 0x247   :  { %2451 = vmatmul.mubr.msk.f32.vlgmr.msra.gmra.mrb[2].mxu0 %vm341_vm12, %v340_v2  ;;  %v727_v2 = vpop.permute.xlu1 %726 }
 0x248   :  { %2472 = vmatprep.mubr.msk.f32.mxu0 %vm552_vm4, %v50_v18  ;;  %v81_v18 = vld [vmem:[%s3308_s7 + $0x128] sm:$0xff] }
 0x31a   :  { %v2452_v6 = vpop.f32.mrb[2].mxu0 }
 0x31b   :  { %v429_v8 = vadd.f32 %v2452_v6, %v427_v5  ;;  %v414_v11 = vpop.f32.mrb[3].mxu0 }
 0x31c   :  { %v428_v12 = vadd.f32 %v426_v7, %v414_v11  ;;  %v732_v11 = vpop.permute.xlu0 %731 }
 0x31e   :  { %v2637_v14 = vpack.c.bf16 %v429_v8, %v428_v12 }
 0x320   :  { %2639 = vmatpush3.bf16.msk.msra.mxu1 %vm2983_vm1, %v2637_v14 }
 0x321   :  { %2650 = vmatprep.subr.bf16.mxu1 %v2743_v3 }
 0x323   :  { %2458 = vmatmul.mubr.msk.f32.vlgmr.msra.gmra.mrb[2].mxu1 %vm445_vm3, %v44_v15 }
 0x324   :  { %2460 = vmatprep.mubr.msk.f32.mxu1 %vm2744_vm13, %v2740_v9 }
 0x327   :  { %2461 = vmatmul.mubr.msk.f32.gmra.mrb[4].mxu1 %vm445_vm3, %v45_v16 }
 0x328   :  { %2463 = vmatprep.mubr.msk.f32.mxu1 %vm2744_vm13, %v2740_v9 }
 0x32b   :  { %2464 = vmatmul.mubr.msk.f32.gmra.mrb[6].mxu1 %vm445_vm3, %v46_v17 }
 0x32c   :  { %2486 = vmatprep.mubr.msk.f32.mxu1 %vm2744_vm13, %v2740_v9 }
 0x3f6   :  { %v525_v21 = vpop.f32.mrb[2].mxu1 }
 0x3f7   :  { %v2459_v22 = vpop.f32.mrb[3].mxu1  ;;  %v526_v23 = vadd.f32 %v525_v21, %v433_v20  ;;  %v832_v21 = vpop.permute.xlu1 %831 }
 0x3f9   :  { %v539_v36 = vmax.f32 %v526_v23, 0.0 }
 0x3fa   :  { %v530_v25 = vpop.f32.mrb[4].mxu1 }
 0x3fb   :  { %v531_v27 = vadd.f32 %v530_v25, %v438_v19  ;;  %v2462_v31 = vpop.f32.mrb[5].mxu1  ;;  %v837_v19 = vpop.permute.xlu0 %836 }
 0x3fd   :  { %v540_v39 = vmax.f32 %v531_v27, 0.0 }
 0x3fe   :  { %v535_v40 = vpop.f32.mrb[6].mxu1 }
 0x3ff   :  { %v2640_v41 = vpack.c.bf16 %v540_v39, %v539_v36  ;;  %v536_v42 = vadd.f32 %v535_v40, %v443_v35  ;;  %v2465_v43 = vpop.f32.mrb[7].mxu1  ;;  %v550_v36 = vpop.permute.xlu0 %549 }
 0x400   :  { %v545_v39 = vpop.permute.xlu1 %544 }
 0x401   :  { %v541_v44 = vmax.f32 %v536_v42, 0.0  ;;  %2641 = vmatprep.subr.bf16.mxu0 %v2640_v41 }
 0x402   :  { %2643 = vmatpush3.bf16.msra.mxu0 %v2640_v41 }
 0x403   :  { %2470 = vmatprep.subr.msk.mxu0 %vm170_vm0, %v541_v44 }
 0x406   :  { %2471 = vmatpush3.msk.msra.mxu0 %vm170_vm0, %v541_v44 }
 0x407   :  { %2473 = vmatmul.mubr.msk.f32.vlgmr.msra.gmra.mrb[4].mxu0 %vm552_vm4, %v51_v47  ;;  %2646 = vmatprep.subr.msk.bf16.mxu0 %vm3023_vm14, %v3020_v48 }
 0x408   :  { %2649 = vmatpush3.bf16.msk.msra.mxu0 %vm3023_vm14, %v3020_v48  ;;  %2479 = vmatprep.mubr.msk.f32.mxu0 %vm253_vm11, %v2962_v57 }
 0x40b   :  { %2480 = vmatmul.mubr.msk.f32.vlgmr.msra.gmra.mrb[6].mxu0 %vm253_vm11, %v2964_v58 }
 0x40c   :  { %2501 = vmatprep.mubr.msk.f32.mxu0 %vm552_vm4, %v80_v61 }
 0x4da   :  { %v3039_v24 = vpop.f32.mrb[4].mxu0 }
 0x4db   :  { %v3041_v50 = vpop.f32.mrb[5].mxu0 }
 0x4dc   :  { %v629_v40 = vadd.f32 %v3041_v50, %v545_v39 }
 0x4de   :  { %v2481_v51 = vpop.f32.mrb[6].mxu0  ;;  %v637_v41 = vmax.f32 %v629_v40, 0.0 }
 0x4df   :  { %v716_v52 = vadd.f32 %v2481_v51, %v2868_v28  ;;  %v710_v53 = vpop.f32.mrb[7].mxu0 }
 0x4e0   :  { %v711_v54 = vadd.f32 %v710_v53, %v2863_v26  ;;  %v639_v44 = vadd.f32 %v637_v41, %v2962_v57  ;;  %v2278_v57 = vld [vmem:[%s3307_s6 + $0x10] sm:$0xff] }
 0x4e2   :  { %v2651_v55 = vpack.c.bf16 %v716_v52, %v711_v54 }
 0x4e4   :  { %2653 = vmatpush3.bf16.msk.msra.mxu1 %vm2983_vm1, %v2651_v55  ;;  %v1179_v55 = vstv %s1178_s29 }
 0x4e5   :  { %2665 = vmatprep.subr.msk.bf16.mxu1 %vm2873_vm5, %v2741_v30 }
 0x4e7   :  { %2487 = vmatmul.mubr.msk.f32.vlgmr.msra.gmra.mrb[8].mxu1 %vm445_vm3, %v74_v56 }
 0x4e8   :  { %2667 = vmatpush3.bf16.msk.msra.mxu1 %vm2873_vm5, %v2741_v30  ;;  %2489 = vmatprep.mubr.msk.f32.mxu1 %vm2744_vm13, %v2740_v9 }
 0x4e9   :  { %2520 = vmatprep.subr.msk.mxu1 %vm2884_vm6, %v2742_v33 }
 0x4eb   :  { %2490 = vmatmul.mubr.msk.f32.gmra.mrb[10].mxu1 %vm445_vm3, %v75_v59 }
 0x4ec   :  { %2521 = vmatpush3.msk.msra.mxu1 %vm2884_vm6, %v2742_v33  ;;  %2492 = vmatprep.mubr.msk.f32.mxu1 %vm2744_vm13, %v2740_v9 }
 0x4ef   :  { %2493 = vmatmul.mubr.msk.f32.gmra.mrb[12].mxu1 %vm445_vm3, %v76_v60 }
 0x5ba   :  { %v812_v62 = vpop.f32.mrb[8].mxu1 }
 0x5bb   :  { %v2488_v63 = vpop.f32.mrb[9].mxu1  ;;  %v813_v1 = vadd.f32 %v812_v62, %v722_v0 }
 0x5bd   :  { %v826_v7 = vmax.f32 %v813_v1, 0.0  ;;  %v54_v1 = vld [vmem:[%s3308_s7 + $0x50] sm:$0xff] }
 0x5be   :  { %v817_v4 = vpop.f32.mrb[10].mxu1 }
 0x5bf   :  { %v818_v5 = vadd.f32 %v817_v4, %v727_v2  ;;  %v2491_v6 = vpop.f32.mrb[11].mxu1  ;;  %v55_v2 = vld [vmem:[%s3308_s7 + $0x58] sm:$0xff]  ;;  %v56_v4 = vld [vmem:[%s3308_s7 + $0x60] sm:$0xff] }
 0x5c1   :  { %v827_v8 = vmax.f32 %v818_v5, 0.0  ;;  %v60_v5 = vld [vmem:[%s3308_s7 + $0x80] sm:$0xff] }
 0x5c2   :  { %v822_v12 = vpop.f32.mrb[12].mxu1 }
 0x5c3   :  { %v2654_v14 = vpack.c.bf16 %v827_v8, %v826_v7  ;;  %v823_v15 = vadd.f32 %v822_v12, %v732_v11  ;;  %v2494_v16 = vpop.f32.mrb[13].mxu1  ;;  %v1187_v8 = vpop.permute.xlu1 %1186 }
 0x5c4   :  { %v1192_v12 = vpop.permute.xlu0 %1191 }
 0x5c5   :  { %v828_v17 = vmax.f32 %v823_v15, 0.0  ;;  %2655 = vmatprep.subr.bf16.mxu0 %v2654_v14 }
 0x5c6   :  { %2657 = vmatpush3.bf16.msra.mxu0 %v2654_v14 }
 0x5c7   :  { %2499 = vmatprep.subr.msk.mxu0 %vm170_vm0, %v828_v17 }
 0x5ca   :  { %2500 = vmatpush3.msk.msra.mxu0 %vm170_vm0, %v828_v17 }
 0x5cb   :  { %2502 = vmatmul.mubr.msk.f32.vlgmr.msra.gmra.mrb[8].mxu0 %vm552_vm4, %v81_v18  ;;  %2504 = vmatprep.subr.msk.mxu0 %vm170_vm0, %v2816_v10 }
 0x5cc   :  { %2505 = vmatpush3.msk.msra.mxu0 %vm170_vm0, %v2816_v10 }
 0x5cd   :  { %2660 = vmatprep.subr.msk.bf16.mxu0 %vm2904_vm10, %v2901_v37 }
 0x69e   :  { %v2503_v20 = vpop.f32.mrb[8].mxu0 }
 0x69f   :  { %v920_v22 = vadd.f32 %v2503_v20, %v837_v19  ;;  %v914_v23 = vpop.f32.mrb[9].mxu0  ;;  %v1197_v19 = vpop.permute.xlu1 %1196 }
 0x6a0   :  { %v915_v25 = vadd.f32 %v914_v23, %v832_v21 }
 0x6a1   :  { %v924_v27 = vmax.f32 %v920_v22, 0.0 }
 0x6a2   :  { %v923_v31 = vmax.f32 %v915_v25, 0.0 }
 0x6a3   :  { %v3096_v35 = vadd.f32 %v924_v27, %v2868_v28  ;;  %v61_v27 = vld [vmem:[%s3308_s7 + $0x88] sm:$0xff] }
 0x6a4   :  { %v3093_v34 = vadd.f32 %v923_v31, %v2863_v26  ;;  %v634_v26 = vadd.f32 %v3039_v24, %v550_v36 }
 0x6a6   :  { %2506 = vmatprep.mubr.msk.f32.mxu0 %vm165_vm2, %v3093_v34  ;;  %v638_v28 = vmax.f32 %v634_v26, 0.0 }
 0x6a7   :  { %2507 = vmatmul.mubr.msk.f32.vlgmr.msra.gmra.mrb[10].mxu0 %vm165_vm2, %v3096_v35 }
 0x6a8   :  { %2663 = vmatpush3.bf16.msk.msra.mxu0 %vm2904_vm10, %v2901_v37  ;;  %v640_v42 = vadd.f32 %v638_v28, %v2964_v58  ;;  %v2279_v58 = vld [vmem:[%s3307_s6 + $0x18] sm:$0x1] }
 0x6a9   :  { %2668 = vmatprep.subr.bf16.mxu0 %v2743_v3 }
 0x77a   :  { %v2508_v43 = vpop.f32.mrb[10].mxu0 }
 0x77b   :  { %v3110_v45 = vadd.f32 %v2508_v43, %v640_v42  ;;  %v999_v46 = vpop.f32.mrb[11].mxu0  ;;  %v84_v42 = vld [vmem:[%s3308_s7 + $0x140] sm:$0xff]  ;;  %v85_v43 = vld [vmem:[%s3308_s7 + $0x148] sm:$0xff] }
 0x77c   :  { %v3112_v47 = vadd.f32 %v999_v46, %v639_v44 }
 0x77d   :  { %v1181_v56 = vmul.f32 %v1179_v55, %v3110_v45 }
 0x77e   :  { %2513 = vmatprep.mubr.msk.f32.mxu0 %vm253_vm11, %v3112_v47  ;;  %v1180_v60 = vmul.f32 %v1179_v55, %v3112_v47 }
 0x77f   :  { %2514 = vmatmul.mubr.msk.f32.vlgmr.msra.gmra.mrb[12].mxu0 %vm253_vm11, %v3110_v45 }
 0x780   :  { %2529 = vmatprep.mubr.msk.f32.mxu0 %vm2744_vm13, %v2740_v9 }
 0x852   :  { %v2515_v24 = vpop.f32.mrb[12].mxu0 }
 0x853   :  { %v1091_v50 = vadd.f32 %v2515_v24, %v2279_v58  ;;  %v1085_v51 = vpop.f32.mrb[13].mxu0  ;;  %v1470_v58 = vpop.permute.xlu0 %1469 }
 0x854   :  { %v1086_v52 = vadd.f32 %v2278_v57, %v1085_v51 }
 0x855   :  { %v1095_v54 = vmax.f32 %v1091_v50, 0.0 }
 0x856   :  { %v1094_v53 = vmax.f32 %v1086_v52, 0.0 }
 0x858   :  { %2522 = vmatprep.mubr.msk.f32.mxu1 %vm341_vm12, %v1094_v53  ;;  %v1480_v53 = vpop.permute.xlu0 %1479 }
 0x859   :  { %2523 = vmatmul.mubr.msk.f32.vlgmr.msra.gmra.mrb[14].mxu1 %vm341_vm12, %v1095_v54 }
 0x85a   :  { %2544 = vmatprep.mubr.msk.f32.mxu1 %vm552_vm4, %v60_v5 }
 0x92c   :  { %v2524_v59 = vpop.f32.mrb[14].mxu1 }
 0x92d   :  { %v1183_v61 = vadd.f32 %v2524_v59, %v1181_v56  ;;  %v1168_v62 = vpop.f32.mrb[15].mxu1 }
 0x92e   :  { %v1182_v63 = vadd.f32 %v1180_v60, %v1168_v62  ;;  %v1585_v62 = vpop.permute.xlu0 %1584 }
 0x930   :  { %v2669_v0 = vpack.c.bf16 %v1183_v61, %v1182_v63  ;;  %v91_v61 = vld [vmem:[%s3308_s7 + $0x178] sm:$0xff] }
 0x932   :  { %2671 = vmatpush3.bf16.msk.msra.mxu0 %vm2983_vm1, %v2669_v0 }
 0x935   :  { %2530 = vmatmul.mubr.msk.f32.vlgmr.msra.gmra.mrb[14].mxu0 %vm445_vm3, %v54_v1 }
 0x936   :  { %2532 = vmatprep.mubr.msk.f32.mxu0 %vm2744_vm13, %v2740_v9 }
 0x939   :  { %2533 = vmatmul.mubr.msk.f32.gmra.mrb[16].mxu0 %vm445_vm3, %v55_v2 }
 0x93a   :  { %2535 = vmatprep.mubr.msk.f32.mxu0 %vm2744_vm13, %v2740_v9 }
 0x93d   :  { %2536 = vmatmul.mubr.msk.f32.gmra.mrb[18].mxu0 %vm445_vm3, %v56_v4 }
 0xa08   :  { %v1277_v6 = vpop.f32.mrb[14].mxu0 }
 0xa09   :  { %v2531_v7 = vpop.f32.mrb[15].mxu0  ;;  %v1278_v11 = vadd.f32 %v1277_v6, %v1187_v8 }
 0xa0b   :  { %v1291_v17 = vmax.f32 %v1278_v11, 0.0 }
 0xa0c   :  { %v1282_v14 = vpop.f32.mrb[16].mxu0 }
 0xa0d   :  { %v1283_v15 = vadd.f32 %v1282_v14, %v1192_v12  ;;  %v2534_v16 = vpop.f32.mrb[17].mxu0 }
 0xa0f   :  { %v1292_v18 = vmax.f32 %v1283_v15, 0.0 }
 0xa10   :  { %v1287_v20 = vpop.f32.mrb[18].mxu0 }
 0xa11   :  { %v2672_v21 = vpack.c.bf16 %v1292_v18, %v1291_v17  ;;  %v1288_v22 = vadd.f32 %v1287_v20, %v1197_v19  ;;  %v2537_v23 = vpop.f32.mrb[19].mxu0 }
 0xa13   :  { %v1293_v25 = vmax.f32 %v1288_v22, 0.0  ;;  %2673 = vmatprep.subr.bf16.mxu1 %v2672_v21 }
 0xa14   :  { %2675 = vmatpush3.bf16.msra.mxu1 %v2672_v21 }
 0xa15   :  { %2542 = vmatprep.subr.msk.mxu1 %vm170_vm0, %v1293_v25 }
 0xa18   :  { %2543 = vmatpush3.msk.msra.mxu1 %vm170_vm0, %v1293_v25  ;;  %v1927_v25 = vstv %s1926_s27 }
 0xa19   :  { %2545 = vmatmul.mubr.msk.f32.vlgmr.msra.gmra.mrb[16].mxu1 %vm552_vm4, %v61_v27  ;;  %2678 = vmatprep.subr.msk.bf16.mxu1 %vm3023_vm14, %v3020_v48 }
 0xa1a   :  { %2681 = vmatpush3.bf16.msk.msra.mxu1 %vm3023_vm14, %v3020_v48  ;;  %2551 = vmatprep.mubr.msk.f32.mxu1 %vm253_vm11, %v3112_v47 }
 0xa1b   :  { %2682 = vmatprep.subr.bf16.mxu1 %v2743_v3 }
 0xa1d   :  { %2552 = vmatmul.mubr.msk.f32.vlgmr.msra.gmra.mrb[18].mxu1 %vm253_vm11, %v3110_v45 }
 0xa1e   :  { %2558 = vmatprep.mubr.msk.f32.mxu1 %vm2744_vm13, %v2740_v9 }
 0xaec   :  { %v3171_v31 = vpop.f32.mrb[16].mxu1 }
 0xaed   :  { %v3173_v36 = vpop.f32.mrb[17].mxu1 }
 0xaf0   :  { %v2553_v39 = vpop.f32.mrb[18].mxu1 }
 0xaf1   :  { %v1464_v26 = vadd.f32 %v2553_v39, %v3096_v35  ;;  %v1458_v40 = vpop.f32.mrb[19].mxu1 }
 0xaf2   :  { %v1459_v28 = vadd.f32 %v1458_v40, %v3093_v34 }
 0xaf4   :  { %v2683_v41 = vpack.c.bf16 %v1464_v26, %v1459_v28 }
 0xaf6   :  { %2685 = vmatpush3.bf16.msk.msra.mxu1 %vm2983_vm1, %v2683_v41  ;;  %v64_v41 = vld [vmem:[%s3308_s7 + $0xa0] sm:$0xff] }
 0xaf7   :  { %2697 = vmatprep.subr.msk.bf16.mxu1 %vm2873_vm5, %v2741_v30 }
 0xaf9   :  { %2559 = vmatmul.mubr.msk.f32.vlgmr.msra.gmra.mrb[20].mxu1 %vm445_vm3, %v84_v42  ;;  %v65_v42 = vld [vmem:[%s3308_s7 + $0xa8] sm:$0xff] }
 0xafa   :  { %2699 = vmatpush3.bf16.msk.msra.mxu1 %vm2873_vm5, %v2741_v30  ;;  %2561 = vmatprep.mubr.msk.f32.mxu1 %vm2744_vm13, %v2740_v9  ;;  %v90_v30 = vld [vmem:[%s3308_s7 + $0x170] sm:$0xff]  ;;  %vm2228_vm5 = vcmask 0  }
 0xafb   :  { %2592 = vmatprep.subr.msk.mxu1 %vm2884_vm6, %v2742_v33  ;;  %2573 = vmatprep.mubr.msk.f32.mxu0 %vm552_vm4, %v90_v30 }
 0xafd   :  { %2562 = vmatmul.mubr.msk.f32.gmra.mrb[22].mxu1 %vm445_vm3, %v85_v43  ;;  %v70_v43 = vld [vmem:[%s3308_s7 + $0xd0] sm:$0xff] }
 0xafe   :  { %2593 = vmatpush3.msk.msra.mxu1 %vm2884_vm6, %v2742_v33  ;;  %2564 = vmatprep.mubr.msk.f32.mxu1 %vm2744_vm13, %v2740_v9  ;;  %v1475_v33 = vpop.permute.xlu1 %1474  ;;  %vm2226_vm6 = vcmask 7168  }
 0xb01   :  { %2565 = vmatmul.mubr.msk.f32.gmra.mrb[24].mxu1 %vm445_vm3, %v86_v29 }
 0xb02   :  { %v1580_v0 = vpop.permute.xlu1 %1579 }
 0xb06   :  { %v1297_v11 = vpop.permute.xlu1 %1296 }
 0xb07   :  { %v1380_v14 = vadd.f32 %v3173_v36, %v1297_v11 }
 0xbcc   :  { %v1560_v44 = vpop.f32.mrb[20].mxu1 }
 0xbcd   :  { %v2560_v46 = vpop.f32.mrb[21].mxu1  ;;  %v1561_v32 = vadd.f32 %v1560_v44, %v1470_v58  ;;  %v1935_v44 = vpop.permute.xlu1 %1934 }
 0xbcf   :  { %v1574_v51 = vmax.f32 %v1561_v32, 0.0 }
 0xbd0   :  { %v1565_v57 = vpop.f32.mrb[22].mxu1 }
 0xbd1   :  { %v1566_v24 = vadd.f32 %v1565_v57, %v1475_v33  ;;  %v2563_v50 = vpop.f32.mrb[23].mxu1 }
 0xbd2   :  { %v1945_v50 = vpop.permute.xlu1 %1944 }
 0xbd3   :  { %v1575_v52 = vmax.f32 %v1566_v24, 0.0 }
 0xbd4   :  { %v1570_v54 = vpop.f32.mrb[24].mxu1 }
 0xbd5   :  { %v2686_v55 = vpack.c.bf16 %v1575_v52, %v1574_v51  ;;  %v1571_v56 = vadd.f32 %v1570_v54, %v1480_v53  ;;  %v2566_v59 = vpop.f32.mrb[25].mxu1 }
 0xbd6   :  { %v2050_v59 = vpop.permute.xlu1 %2049 }
 0xbd7   :  { %v1576_v60 = vmax.f32 %v1571_v56, 0.0  ;;  %2687 = vmatprep.subr.bf16.mxu0 %v2686_v55  ;;  %v71_v56 = vld [vmem:[%s3308_s7 + $0xd8] sm:$0xff] }
 0xbd8   :  { %2689 = vmatpush3.bf16.msra.mxu0 %v2686_v55 }
 0xbd9   :  { %2571 = vmatprep.subr.msk.mxu0 %vm170_vm0, %v1576_v60 }
 0xbdc   :  { %2572 = vmatpush3.msk.msra.mxu0 %vm170_vm0, %v1576_v60 }
 0xbdd   :  { %2574 = vmatmul.mubr.msk.f32.vlgmr.msra.gmra.mrb[20].mxu0 %vm552_vm4, %v91_v61  ;;  %2576 = vmatprep.subr.msk.mxu0 %vm170_vm0, %v2816_v10 }
 0xbde   :  { %2577 = vmatpush3.msk.msra.mxu0 %vm170_vm0, %v2816_v10  ;;  %v1302_v10 = vpop.permute.xlu0 %1301 }
 0xbdf   :  { %2692 = vmatprep.subr.msk.bf16.mxu0 %vm2904_vm10, %v2901_v37  ;;  %v1385_v12 = vadd.f32 %v3171_v31, %v1302_v10 }
 0xbe1   :  { %v1389_v15 = vmax.f32 %v1385_v12, 0.0 }
 0xbe2   :  { %v1940_v58 = vpop.permute.xlu0 %1939 }
 0xbe6   :  { %v2045_v61 = vpop.permute.xlu0 %2044 }
 0xcb0   :  { %v2575_v63 = vpop.f32.mrb[20].mxu0 }
 0xcb1   :  { %v1668_v1 = vadd.f32 %v2575_v63, %v1585_v62  ;;  %v1662_v2 = vpop.f32.mrb[21].mxu0 }
 0xcb2   :  { %v1663_v4 = vadd.f32 %v1662_v2, %v1580_v0 }
 0xcb3   :  { %v1672_v5 = vmax.f32 %v1668_v1, 0.0 }
 0xcb4   :  { %v1671_v6 = vmax.f32 %v1663_v4, 0.0 }
 0xcb5   :  { %v1674_v8 = vadd.f32 %v1672_v5, %v3096_v35  ;;  %v1391_v35 = vadd.f32 %v1389_v15, %v3110_v45 }
 0xcb6   :  { %v1673_v7 = vadd.f32 %v1671_v6, %v3093_v34  ;;  %v1388_v34 = vmax.f32 %v1380_v14, 0.0 }
 0xcb8   :  { %2578 = vmatprep.mubr.msk.f32.mxu0 %vm165_vm2, %v1673_v7  ;;  %v1390_v17 = vadd.f32 %v1388_v34, %v3112_v47 }
 0xcb9   :  { %2579 = vmatmul.mubr.msk.f32.vlgmr.msra.gmra.mrb[22].mxu0 %vm165_vm2, %v1674_v8 }
 0xcba   :  { %2695 = vmatpush3.bf16.msk.msra.mxu0 %vm2904_vm10, %v2901_v37  ;;  %v2312_v37 = vld [vmem:[%s3307_s6 + $0x28] sm:$0x1] }
 0xcbb   :  { %2700 = vmatprep.subr.bf16.mxu0 %v2743_v3  ;;  %v2311_v3 = vld [vmem:[%s3307_s6 + $0x20] sm:$0xff] }
 0xd8c   :  { %v2580_v16 = vpop.f32.mrb[22].mxu0 }
 0xd8d   :  { %v3236_v18 = vadd.f32 %v2580_v16, %v1391_v35  ;;  %v1747_v19 = vpop.f32.mrb[23].mxu0 }
 0xd8e   :  { %v3238_v38 = vadd.f32 %v1747_v19, %v1390_v17 }
 0xd8f   :  { %v1929_v27 = vmul.f32 %v1927_v25, %v3236_v18 }
 0xd90   :  { %2585 = vmatprep.mubr.msk.f32.mxu0 %vm253_vm11, %v3238_v38  ;;  %v1928_v36 = vmul.f32 %v1927_v25, %v3238_v38 }
 0xd91   :  { %2586 = vmatmul.mubr.msk.f32.vlgmr.msra.gmra.mrb[24].mxu0 %vm253_vm11, %v3236_v18 }
 0xd92   :  { %2601 = vmatprep.mubr.msk.f32.mxu0 %vm2744_vm13, %v2740_v9 }
 0xe64   :  { %v2587_v45 = vpop.f32.mrb[24].mxu0 }
 0xe65   :  { %v1839_v47 = vadd.f32 %v2587_v45, %v2312_v37  ;;  %v1833_v20 = vpop.f32.mrb[25].mxu0 }
 0xe66   :  { %v1834_v21 = vadd.f32 %v2311_v3, %v1833_v20 }
 0xe67   :  { %v1843_v23 = vmax.f32 %v1839_v47, 0.0 }
 0xe68   :  { %v1842_v22 = vmax.f32 %v1834_v21, 0.0 }
 0xe6a   :  { %2594 = vmatprep.mubr.msk.f32.mxu1 %vm341_vm12, %v1842_v22 }
 0xe6b   :  { %2595 = vmatmul.mubr.msk.f32.vlgmr.msra.gmra.mrb[26].mxu1 %vm341_vm12, %v1843_v23 }
 0xe6c   :  { %2616 = vmatprep.mubr.msk.f32.mxu1 %vm552_vm4, %v70_v43 }
 0xf3e   :  { %v2596_v31 = vpop.f32.mrb[26].mxu1 }
 0xf3f   :  { %v1931_v39 = vadd.f32 %v2596_v31, %v1929_v27  ;;  %v1916_v26 = vpop.f32.mrb[27].mxu1 }
 0xf40   :  { %v1930_v40 = vadd.f32 %v1928_v36, %v1916_v26 }
 0xf42   :  { %v2701_v28 = vpack.c.bf16 %v1931_v39, %v1930_v40 }
 0xf44   :  { %2703 = vmatpush3.bf16.msk.msra.mxu0 %vm2983_vm1, %v2701_v28 }
 0xf47   :  { %2602 = vmatmul.mubr.msk.f32.vlgmr.msra.gmra.mrb[26].mxu0 %vm445_vm3, %v64_v41 }
 0xf48   :  { %2604 = vmatprep.mubr.msk.f32.mxu0 %vm2744_vm13, %v2740_v9 }
 0xf4b   :  { %2605 = vmatmul.mubr.msk.f32.gmra.mrb[28].mxu0 %vm445_vm3, %v65_v42 }
 0xf4c   :  { %2607 = vmatprep.mubr.msk.f32.mxu0 %vm2744_vm13, %v2740_v9 }
 0xf4f   :  { %2608 = vmatmul.mubr.msk.f32.gmra.mrb[30].mxu0 %vm445_vm3, %v66_v13 }
0x101a   :  { %v2025_v29 = vpop.f32.mrb[26].mxu0 }
0x101b   :  { %v2603_v30 = vpop.f32.mrb[27].mxu0  ;;  %v2026_v46 = vadd.f32 %v2025_v29, %v1935_v44 }
0x101d   :  { %v2039_v57 = vmax.f32 %v2026_v46, 0.0 }
0x101e   :  { %v2030_v32 = vpop.f32.mrb[28].mxu0 }
0x101f   :  { %v2031_v33 = vadd.f32 %v2030_v32, %v1940_v58  ;;  %v2606_v9 = vpop.f32.mrb[29].mxu0 }
0x1021   :  { %v2040_v24 = vmax.f32 %v2031_v33, 0.0 }
0x1022   :  { %v2035_v51 = vpop.f32.mrb[30].mxu0 }
0x1023   :  { %v2704_v52 = vpack.c.bf16 %v2040_v24, %v2039_v57  ;;  %v2036_v53 = vadd.f32 %v2035_v51, %v1945_v50  ;;  %v2609_v54 = vpop.f32.mrb[31].mxu0 }
0x1025   :  { %v2041_v55 = vmax.f32 %v2036_v53, 0.0  ;;  %2705 = vmatprep.subr.bf16.mxu1 %v2704_v52 }
0x1026   :  { %2707 = vmatpush3.bf16.msra.mxu1 %v2704_v52 }
0x1027   :  { %2614 = vmatprep.subr.msk.mxu1 %vm170_vm0, %v2041_v55 }
0x102a   :  { %2615 = vmatpush3.msk.msra.mxu1 %vm170_vm0, %v2041_v55  ;;  %vm2222_vm0 = vcmask 8192  }
0x102b   :  { %2617 = vmatmul.mubr.msk.f32.vlgmr.msra.gmra.mrb[28].mxu1 %vm552_vm4, %v71_v56  ;;  %2710 = vmatprep.subr.msk.bf16.mxu1 %vm3023_vm14, %v3020_v48 }
0x102c   :  { %2713 = vmatpush3.bf16.msk.msra.mxu1 %vm3023_vm14, %v3020_v48 }
0x10fe   :  { %v2618_v60 = vpop.f32.mrb[28].mxu1 }
0x10ff   :  { %v2133_v62 = vadd.f32 %v2618_v60, %v2050_v59  ;;  %v2127_v63 = vpop.f32.mrb[29].mxu1 }
0x1100   :  { %v2128_v0 = vadd.f32 %v2127_v63, %v2045_v61 }
0x1101   :  { %v2137_v2 = vadd.f32 %v2133_v62, %v3236_v18 }
0x1102   :  { %v2136_v1 = vadd.f32 %v2128_v0, %v3238_v38 }
0x1104   :  { %2623 = vmatprep.mubr.msk.f32.mxu1 %vm253_vm11, %v2136_v1 }
0x1105   :  { %2624 = vmatmul.mubr.msk.f32.vlgmr.msra.gmra.mrb[30].mxu1 %vm253_vm11, %v2137_v2 }
0x11d8   :  { %v2625_v4 = vpop.f32.mrb[30].mxu1 }
0x11d9   :  { %v2210_v5 = vpop.f32.mrb[31].mxu1  ;;  %v2223_v6 = vsel %vm2222_vm0, %v2625_v4, 0.0 }
0x11da   :  { %2224 = vadd.xlane.f32.xlu1 %v2223_v6  ;;  %v2219_v48 = vsel %vm165_vm2, %v2210_v5, 0.0 }
0x11db   :  { %2220 = vadd.xlane.f32.xlu0 %v2219_v48 }
0x1267   :  { %v2225_v49 = vpop.xlane.xlu1 %2224 }
0x1268   :  { %2229 = vst.msk [vmem:[%s3309_s8 + $0x8] sm:$0x1] %vm2228_vm5, %v2225_v49  ;;  %v2221_v7 = vpop.xlane.xlu0 %2220 }
0x1269   :  { %2227 = vst.msk [vmem:[%s3309_s8] sm:$0xff] %vm2226_vm6, %v2221_v7 }
0x126a   :  { %2234 = vsyncpa [#allocation3], 1 }

</bundles_post_ra>
